<compile_context>
chip_gen: v6e
topology: v6e:2x2x1
jax: 0.10.0
libtpu: 0.0.40
codegen_flags: <defaults>
</compile_context>

<pallas_src>
import jax
import jax.numpy as jnp
from jax import lax
from jax.experimental import pallas as pl
from jax.experimental.pallas import tpu as pltpu


# ------------------------- Pallas kernel ------------------------- #

def _mclr_kernel(x_ref, w_ref, b_ref, o_ref):
    # x_ref: (N, D)  w_ref: (NC, D)  b_ref: (1, NC)  o_ref: (N, NC)
    # Contract x's feature dim with w's feature dim -> (N, NC); MXU handles the
    # orientation in-chip (no host-side transpose HLO needed).
    logits = lax.dot_general(
        x_ref[...], w_ref[...],
        dimension_numbers=(((1,), (1,)), ((), ())),
        preferred_element_type=jnp.float32,
    ) + b_ref[...]
    # log_softmax over the class (last / lane) dim, numerically stable.
    m = jnp.max(logits, axis=-1, keepdims=True)
    z = logits - m
    lse = jnp.log(jnp.sum(jnp.exp(z), axis=-1, keepdims=True))
    o_ref[...] = z - lse


def mclr_forward(x, w, b):
    """x: (N, in_dim, H, W) float32; w: (NC, in_dim*H*W); b: (NC,)."""
    N = x.shape[0]
    nc, d = w.shape
    x_flat = x.reshape(N, d)      # == PyTorch .view(-1, in_dim*H*W) on NCHW (free reshape)
    b2 = b.reshape(1, nc)         # tiny reshape, folded by XLA

    cost = pl.CostEstimate(
        flops=2 * N * d * nc,
        transcendentals=N * nc,                       # exp per logit
        bytes_accessed=4 * (N * d + nc * d + nc + N * nc),
    )

    vmem = pltpu.MemorySpace.VMEM
    return pl.pallas_call(
        _mclr_kernel,
        out_shape=jax.ShapeDtypeStruct((N, nc), jnp.float32),
        in_specs=[
            pl.BlockSpec(memory_space=vmem),   # x_flat (N, D)
            pl.BlockSpec(memory_space=vmem),   # w      (NC, D)
            pl.BlockSpec(memory_space=vmem),   # bias   (1, NC)
        ],
        out_specs=pl.BlockSpec(memory_space=vmem),
        cost_estimate=cost,
    )(x_flat, w, b2)


# ------------------------- pure-JAX reference ------------------------- #

def reference_forward(x, w, b):
    N = x.shape[0]
    flat = x.reshape(N, -1)
    logits = flat @ w.T + b
    return jax.nn.log_softmax(logits, axis=1)


# ------------------------- main ------------------------- #

if __name__ == "__main__":
    N, IN_DIM, H, W, NC = 2, 4, 16, 16, 10
    D = IN_DIM * H * W

    keys = jax.random.split(jax.random.PRNGKey(0), 3)
    w = jax.random.normal(keys[0], (NC, D), jnp.float32) * 0.05
    b = jax.random.normal(keys[1], (NC,), jnp.float32) * 0.05
    x = jax.random.normal(keys[2], (N, IN_DIM, H, W), jnp.float32)

    out = jax.block_until_ready(mclr_forward(x, w, b))
    ref = jax.block_until_ready(reference_forward(x, w, b))

    assert out.shape == (N, NC), out.shape
    assert bool(jnp.all(jnp.isfinite(out)))
    assert bool(jnp.allclose(out, ref, atol=1e-3, rtol=1e-3)), (out, ref)
    print("KERNEL_OK")
</pallas_src>

<mosaic_0001>
module attributes {stable_mosaic.version = 11 : i64} {
  func.func @_mclr_kernel(%arg0: memref<2x1024xf32, #tpu.memory_space<vmem>>, %arg1: memref<10x1024xf32, #tpu.memory_space<vmem>>, %arg2: memref<1x10xf32, #tpu.memory_space<vmem>>, %arg3: memref<2x10xf32, #tpu.memory_space<vmem>>) attributes {dimension_semantics = [], scalar_prefetch = 0 : i64, scratch_operands = 0 : i64, tpu.core_type = #tpu.core_type<tc>} {
    %c0 = arith.constant 0 : index
    %c0_0 = arith.constant 0 : index
    %0 = vector.load %arg0[%c0, %c0_0] : memref<2x1024xf32, #tpu.memory_space<vmem>>, vector<2x1024xf32>
    %c0_1 = arith.constant 0 : index
    %c0_2 = arith.constant 0 : index
    %1 = vector.load %arg1[%c0_1, %c0_2] : memref<10x1024xf32, #tpu.memory_space<vmem>>, vector<10x1024xf32>
    %cst = arith.constant dense<0.000000e+00> : vector<2x10xf32>
    %2 = tpu.matmul %0, %1, %cst {dimension_numbers = #tpu.dot_dimension_numbers<[1], [1], [0], [0], [0, 0, 1, 0], [], []>} : vector<2x1024xf32>, vector<10x1024xf32>, vector<2x10xf32> -> vector<2x10xf32>
    %c0_3 = arith.constant 0 : index
    %c0_4 = arith.constant 0 : index
    %3 = vector.load %arg2[%c0_3, %c0_4] : memref<1x10xf32, #tpu.memory_space<vmem>>, vector<1x10xf32>
    %4 = vector.broadcast %3 : vector<1x10xf32> to vector<2x10xf32>
    %5 = arith.addf %2, %4 : vector<2x10xf32>
    %cst_5 = arith.constant dense<0xFF800000> : vector<2xf32>
    %6 = vector.multi_reduction <maximumf>, %5, %cst_5 [1] : vector<2x10xf32> to vector<2xf32>
    %7 = vector.shape_cast %6 : vector<2xf32> to vector<2x1xf32>
    %8 = vector.broadcast %7 : vector<2x1xf32> to vector<2x10xf32>
    %9 = arith.subf %5, %8 : vector<2x10xf32>
    %10 = math.exp %9 : vector<2x10xf32>
    %cst_6 = arith.constant dense<0.000000e+00> : vector<2xf32>
    %11 = vector.multi_reduction <add>, %10, %cst_6 [1] : vector<2x10xf32> to vector<2xf32>
    %12 = vector.shape_cast %11 : vector<2xf32> to vector<2x1xf32>
    %13 = math.log %12 : vector<2x1xf32>
    %14 = vector.broadcast %13 : vector<2x1xf32> to vector<2x10xf32>
    %15 = arith.subf %9, %14 : vector<2x10xf32>
    %c0_7 = arith.constant 0 : index
    %c0_8 = arith.constant 0 : index
    %16 = vector.load %arg3[%c0_7, %c0_8] : memref<2x10xf32, #tpu.memory_space<vmem>>, vector<2x10xf32>
    tpu.vector_store %arg3[%c0_7, %c0_8], %15 {strides = array<i32>} : memref<2x10xf32, #tpu.memory_space<vmem>>, vector<2x10xf32>,
    return
  }
}

</mosaic_0001>

<bundles_post_ra>
// kernel: tpu_custom_call.1
= control target key start
LH: loop header
LB: loop body
LE: loop exit
PB: predicated region body
PF: predicated region fallthrough
CT: control target
= control target key end

     0   :  { %8 = vsyncpa [#allocation3], 0  ;;  %s540_s0 = inlined_call_operand.hbm [shape: f32[2,1024], index: 0, kind: input, shape index: {}]   ;;  %s541_s1 = inlined_call_operand.hbm [shape: f32[10,1024], index: 1, kind: input, shape index: {}]   ;;  %s542_s2 = inlined_call_operand.vmem [shape: f32[1,10], index: 2, kind: input, shape index: {}]   ;;  %s543_s3 = inlined_call_operand.hbm [shape: f32[2,10], index: 3, kind: output, shape index: {}]  }
   0x1   :  { %9 = vsyncpa [#allocation6], 0 }
   0x2   :  { %10 = vsyncpa [#allocation4], 0  ;;  %s499_s12 = smov [#allocation2]   ;;  %s500_s14 = smov [#allocation5]  }
   0x3   :  { %s17_s13 = sshll.u32 %s499_s12, 4  ;;  %s26_s15 = sshll.u32 %s500_s14, 4  ;;  %s18_s13 = int_to_ptr.vmem [resolvable:$true] %s17_s13  ;;  %s27_s15 = int_to_ptr.vmem [resolvable:$true] %s26_s15 }
   0x4   :  { %s441_s16 = scalar_lea.vmem %s18_s13, 256  ;;  %p446_p1 = scmp.lt.s32.totalorder %s18_s13, %s18_s13 }
   0x5   :  { %p442_p0 = scmp.ne.s32.totalorder %s18_s13, %s441_s16  ;;  %p447_p2 = scmp.lt.s32.totalorder %s441_s16, %s441_s16 }
   0x7   :  { %p448_p3 = por %p447_p2, %p446_p1 }
   0x9   :  { %p449_p4 = pnand %p448_p3, %p442_p0 }
   0xb   :  { %452 = shalt.err (!%p449_p4)
}
   0xc   :  { %20 = dma.hbm_to_vmem [thread:$0]  %s540_s0, 256, %s18_s13, [#allocation3]  }
   0xd   :  { %s461_s19 = scalar_lea.vmem %s27_s15, 2048  ;;  %p466_p6 = scmp.lt.s32.totalorder %s27_s15, %s27_s15 }
   0xe   :  { %p462_p5 = scmp.ne.s32.totalorder %s27_s15, %s461_s19  ;;  %p467_p7 = scmp.lt.s32.totalorder %s461_s19, %s461_s19 }
  0x10   :  { %p468_p8 = por %p467_p7, %p466_p6 }
  0x12   :  { %p469_p9 = pnand %p468_p8, %p462_p5 }
  0x14   :  { %472 = shalt.err (!%p469_p9)
}
  0x15   :  { %s501_s20 = smov 1024   ;;  %s502_s21 = smov 64  }
  0x16   :  { %32 = dma.hbm_to_vmem [thread:$0]  %s541_s1, 2048, %s27_s15, [#allocation6], %s501_s20, %s501_s20, %s502_s21  }
  0x17   :  { %493 = dma.done.wait [#allocation3], 256  }
  0x18   :  { %494 = vsyncadd [#allocation3], 4294967040 }
  0x19   :  { %495 = dma.done.wait [#allocation6], 2048  }
  0x1a   :  { %496 = vsyncadd [#allocation6], 4294965248  ;;  %v72_v0 = vlaneseq  ;;  %v503_v1 = vmov 1983009808   ;;  %v52_v6 = vld [vmem:[#allocation5 + $0x48] sm:$0x3] }
  0x1b   :  { %v70_v2 = vunpack.c.l.s4 %v503_v1  ;;  %v54_v7 = vld [vmem:[#allocation5 + $0x58] sm:$0x3]  ;;  %v51_v8 = vld [vmem:[#allocation5 + $0x40] sm:$0x3]  ;;  %138 = vmatprep.subr.mxu0 %v52_v6  ;;  %v53_v9 = vld [vmem:[#allocation5 + $0x50] sm:$0x3] }
  0x1c   :  { %v73_v3 = vshrl.u32 %v72_v0, 7  ;;  %208 = vmatprep.subr.mxu1 %v54_v7  ;;  %v44_v10 = vld [vmem:[#allocation5 + $0x8] sm:$0xff]  ;;  %v46_v11 = vld [vmem:[#allocation5 + $0x18] sm:$0xff]  ;;  %139 = vmatpush1.xpose.msra.mxu0 %v51_v8  ;;  %v41_v12 = vld [vmem:[#allocation2] sm:$0xff]  ;;  %vm390_vm0 = vcmask 74752  }
  0x1d   :  { %v71_v4 = vunpack.c.0.s8 %v70_v2  ;;  %209 = vmatpush1.xpose.msra.mxu1 %v53_v9  ;;  %140 = vmatprep.subr.mxu0 %v44_v10  ;;  %v43_v13 = vld [vmem:[#allocation5] sm:$0xff]  ;;  %v45_v14 = vld [vmem:[#allocation5 + $0x10] sm:$0xff]  ;;  %v68_v16 = vcombine.high %v41_v12, %v41_v12  ;;  %v56_v17 = vld [vmem:[#allocation5 + $0x68] sm:$0x3] }
  0x1e   :  { %210 = vmatprep.subr.mxu1 %v46_v11  ;;  %v58_v20 = vld [vmem:[#allocation5 + $0x78] sm:$0x3]  ;;  %v55_v25 = vld [vmem:[#allocation5 + $0x60] sm:$0x3]  ;;  %v57_v26 = vld [vmem:[#allocation5 + $0x70] sm:$0x3] }
  0x1f   :  { %v74_v5 = vsub.s32 %v71_v4, %v73_v3  ;;  %v42_v21 = vld [vmem:[#allocation2 + $0x8] sm:$0xff]  ;;  %v48_v27 = vld [vmem:[#allocation5 + $0x28] sm:$0xff]  ;;  %v47_v32 = vld [vmem:[#allocation5 + $0x20] sm:$0xff] }
  0x20   :  { %141 = vmatpush1.xpose.msra.mxu0 %v43_v13  ;;  %v85_v23 = vcombine.high %v42_v21, %v42_v21  ;;  %v50_v30 = vld [vmem:[#allocation5 + $0x38] sm:$0xff]  ;;  %v49_v33 = vld [vmem:[#allocation5 + $0x30] sm:$0xff] }
  0x21   :  { %v75_v15 = vrot.slane %v41_v12, %v74_v5  ;;  %v82_v19 = vrot.slane %v68_v16, %v74_v5  ;;  %211 = vmatpush1.xpose.msra.mxu1 %v45_v14  ;;  %v92_v22 = vrot.slane %v42_v21, %v74_v5  ;;  %278 = vmatprep.subr.mxu0 %v56_v17  ;;  %v420_v34 = vld [vmem:[%s542_s2] ss:$0 sm:$0xff]  ;;  %s504_s2 = smov [#allocation7]  }
  0x22   :  { %348 = vmatprep.subr.mxu1 %v58_v20  ;;  %v99_v29 = vrot.slane %v85_v23, %v74_v5  ;;  %s410_s24 = sshll.u32 %s504_s2, 4  ;;  %s411_s24 = int_to_ptr.vmem [resolvable:$true] %s410_s24 }
  0x23   :  { %v83_v18 = vcombine.high %v75_v15, %v75_v15  ;;  %v84_v24 = vcombine.high %v82_v19, %v82_v19  ;;  %v100_v28 = vcombine.high %v92_v22, %v92_v22  ;;  %s473_s25 = scalar_lea.vmem %s411_s24, 32  ;;  %p478_p11 = scmp.lt.s32.totalorder %s411_s24, %s411_s24 }
  0x24   :  { %v101_v31 = vcombine.high %v99_v29, %v99_v29  ;;  %p474_p10 = scmp.ne.s32.totalorder %s411_s24, %s473_s25  ;;  %p479_p12 = scmp.lt.s32.totalorder %s473_s25, %s473_s25 }
  0x25   :  { %174 = vmatprep.mubr.f32.mxu0 %v83_v18  ;;  %244 = vmatprep.mubr.f32.mxu1 %v84_v24 }
  0x26   :  { %175 = vmatmul.mubr.f32.vlgmr.msra.gmra.mxu0 %v75_v15  ;;  %245 = vmatmul.mubr.f32.vlgmr.msra.gmra.mxu1 %v82_v19  ;;  %p480_p13 = por %p479_p12, %p478_p11 }
  0x27   :  { %279 = vmatpush1.xpose.msra.mxu0 %v55_v25  ;;  %349 = vmatpush1.xpose.msra.mxu1 %v57_v26 }
  0x28   :  { %280 = vmatprep.subr.mxu0 %v48_v27  ;;  %350 = vmatprep.subr.mxu1 %v50_v30  ;;  %p481_p0 = pnand %p480_p13, %p474_p10 }
  0x29   :  { %314 = vmatprep.mubr.f32.mxu0 %v100_v28  ;;  %384 = vmatprep.mubr.f32.mxu1 %v101_v31 }
  0x2b   :  { %281 = vmatpush1.xpose.msra.mxu0 %v47_v32  ;;  %351 = vmatpush1.xpose.msra.mxu1 %v49_v33 }
  0x2e   :  { %315 = vmatmul.mubr.f32.vlgmr.msra.gmra.mxu0 %v92_v22  ;;  %385 = vmatmul.mubr.f32.vlgmr.msra.gmra.mxu1 %v99_v29 }
  0xe6   :  { %v176_v35 = vpop.f32.mrf.mxu0  ;;  %v246_v36 = vpop.f32.mrf.mxu1 }
  0xe7   :  { %v177_v38 = vadd.f32 %v420_v34, %v176_v35 }
  0xe8   :  { %v178_v37 = vpop.f32.mrf.mxu0  ;;  %v248_v39 = vpop.f32.mrf.mxu1 }
  0xe9   :  { %v247_v40 = vadd.f32 %v246_v36, %v177_v38 }
  0xee   :  { %v316_v41 = vpop.f32.mrf.mxu0  ;;  %v386_v43 = vpop.f32.mrf.mxu1 }
  0xef   :  { %v317_v42 = vadd.f32 %v316_v41, %v247_v40 }
  0xf0   :  { %v318_v44 = vpop.f32.mrf.mxu0  ;;  %v388_v46 = vpop.f32.mrf.mxu1 }
  0xf1   :  { %v387_v45 = vadd.f32 %v386_v43, %v317_v42 }
  0xf3   :  { %v391_v47 = vsel %vm390_vm0, %v387_v45, -inf }
  0xf4   :  { %392 = vmax.xlane.f32.xlu0 %v391_v47 }
 0x17d   :  { %v393_v48 = vpop.xlane.xlu0 %392 }
 0x17e   :  { %v394_v49 = vsub.f32 %v387_v45, %v393_v48 }
 0x180   :  { %v395_v50 = vmul.f32 1.442695, %v394_v49 }
 0x182   :  { %429 = vpow2.f32 %v395_v50 }
 0x18f   :  { %v430_v51 = vpop.eup %429 }
 0x190   :  { %v397_v52 = vsel %vm390_vm0, %v430_v51, 0.0 }
 0x191   :  { %398 = vadd.xlane.f32.xlu0 %v397_v52 }
 0x21a   :  { %v399_v53 = vpop.xlane.xlu0 %398 }
 0x21b   :  { %431 = vlog2.f32 %v399_v53 }
 0x228   :  { %v432_v54 = vpop.eup %431 }
 0x229   :  { %v401_v55 = vmul.f32 0.6931472, %v432_v54 }
 0x22b   :  { %v402_v56 = vsub.f32 %v394_v49, %v401_v55 }
 0x22d   :  { %403 = vst.msk [vmem:[#allocation7] sm:$0x3] %vm390_vm0, %v402_v56 }
 0x22e   :  { %484 = shalt.err (!%p481_p0)
}
 0x22f   :  { %413 = dma.vmem_to_hbm [thread:$0]  %s411_s24, 32, %s543_s3, [#allocation4]  }
 0x230   :  { %497 = dma.done.wait [#allocation4], 32  }
 0x231   :  { %498 = vsyncadd [#allocation4], 4294967264 }
 0x232   :  { %417 = vsyncpa [#allocation3], 1 }
 0x233   :  { %418 = vsyncpa [#allocation6], 1 }
 0x234   :  { %419 = vsyncpa [#allocation4], 1 }

</bundles_post_ra>
